<compile_context>
chip_gen: v6e
topology: v6e:2x2x1
jax: 0.10.0
libtpu: 0.0.40
codegen_flags: <defaults>
</compile_context>

<pallas_src>
import functools

import jax
import jax.numpy as jnp
from jax.experimental import pallas as pl
from jax.experimental.pallas import tpu as pltpu


def _actor_kernel(x_ref, w_ref, b_ref, out_ref, *, NP, maxaction):
    """Fused 3-layer tanh MLP on one batch tile.

    x_ref:   (TB, KP)            zero-padded state tile
    w_ref:   (KP, 2*NP + OP)     [W1 | W2 | W3] packed, every block 128-aligned
    b_ref:   (1,  2*NP + OP)     [b1 | b2 | b3] packed (always f32)
    out_ref: (TB, OP)            lane-dense padded action output
    """
    cdt = w_ref.dtype                       # compute dtype for the MXU operands
    x = x_ref[...]                          # (TB, KP)

    # ---- l1 + tanh: contract the full padded KP rows (padded rows are zero) ----
    h = jnp.dot(x.astype(cdt), w_ref[:, 0:NP],
                preferred_element_type=jnp.float32)
    h = jnp.tanh(h + b_ref[:, 0:NP])        # (TB, NP); padded cols stay exactly 0

    # ---- l2 + tanh ----
    h = jnp.dot(h.astype(cdt), w_ref[:NP, NP:2 * NP],
                preferred_element_type=jnp.float32)
    h = jnp.tanh(h + b_ref[:, NP:2 * NP])   # (TB, NP)

    # ---- l3 + tanh, scaled (padded out cols: tanh(0) * maxaction = 0) ----
    a = jnp.dot(h.astype(cdt), w_ref[:NP, 2 * NP:],
                preferred_element_type=jnp.float32)
    a = jnp.tanh(a + b_ref[:, 2 * NP:]) * maxaction

    out_ref[...] = a.astype(out_ref.dtype)


def pack_actor_params(params, state_dim, *, param_dtype=jnp.float32):
    """Pack the 3 Linear layers into one lane-aligned weight slab + one bias row.

    Weights are stored transposed vs. PyTorch, i.e. (in_features, out_features).
    Every column block starts at a multiple of 128; rows are padded to KP.
    Call ONCE per parameter set; reuse the packed arrays for every forward.
    Use param_dtype=jnp.bfloat16 for production widths (dot operands only).
    """
    w1, b1 = params["l1"]     # (S, N), (N,)
    w2, b2 = params["l2"]     # (N, N), (N,)
    w3, b3 = params["l3"]     # (N, A), (A,)
    S = state_dim
    N = w1.shape[1]
    A = w3.shape[1]
    NP = 128 * pl.cdiv(N, 128)               # lane-aligned hidden width
    KP = 128 * pl.cdiv(max(S, N), 128)       # lane/sublane-aligned contraction rows
    OP = 128 * pl.cdiv(A, 128)               # lane-dense output width

    w1p = jnp.zeros((KP, NP), param_dtype).at[:S, :N].set(w1.astype(param_dtype))
    w2p = jnp.zeros((KP, NP), param_dtype).at[:N, :N].set(w2.astype(param_dtype))
    w3p = jnp.zeros((KP, OP), param_dtype).at[:N, :A].set(w3.astype(param_dtype))
    w_slab = jnp.concatenate([w1p, w2p, w3p], axis=1)   # (KP, 2*NP + OP)

    b_row = jnp.zeros((1, 2 * NP + OP), jnp.float32)
    b_row = b_row.at[0, 0:N].set(b1)
    b_row = b_row.at[0, NP:NP + N].set(b2)
    b_row = b_row.at[0, 2 * NP:2 * NP + A].set(b3)

    meta = dict(state_dim=S, net_width=N, action_dim=A,
                n_pad=NP, k_pad=KP, out_pad=OP)
    return w_slab, b_row, meta


def actor_forward_packed(state, w_slab, b_row, meta, maxaction, *,
                         batch_tile=256, return_padded=False):
    """Run the fused Actor forward.

    Returns (B, action_dim) actions, or the padded (B_pad, out_pad) slab if
    return_padded=True (cheaper when a downstream fused consumer will slice).
    """
    B = state.shape[0]
    S, A = meta["state_dim"], meta["action_dim"]
    NP, KP, OP = meta["n_pad"], meta["k_pad"], meta["out_pad"]
    W = 2 * NP + OP

    # Batch tile: one sublane-aligned tile for small batches, batch_tile otherwise.
    TB = min(batch_tile, 8 * pl.cdiv(B, 8))
    n_tiles = pl.cdiv(B, TB)
    B_pad = TB * n_tiles

    # Zero-pad state to (B_pad, KP): full-tile contraction, no sub-sublane slice.
    x = jnp.zeros((B_pad, KP), jnp.float32).at[:B, :S].set(state)

    kernel = functools.partial(_actor_kernel, NP=NP, maxaction=float(maxaction))

    out = pl.pallas_call(
        kernel,
        out_shape=jax.ShapeDtypeStruct((B_pad, OP), jnp.float32),
        grid=(n_tiles,),
        in_specs=[
            pl.BlockSpec((TB, KP), lambda i: (i, 0)),   # per-tile state
            pl.BlockSpec((KP, W), lambda i: (0, 0)),    # weight slab, resident
            pl.BlockSpec((1, W), lambda i: (0, 0)),     # bias row, resident
        ],
        out_specs=pl.BlockSpec((TB, OP), lambda i: (i, 0)),
        compiler_params=pltpu.CompilerParams(
            dimension_semantics=("parallel",),          # 2 TCs on v7x; no-op v5e/v6e
        ),
        cost_estimate=pl.CostEstimate(
            flops=2 * B_pad * (KP * NP + NP * NP + NP * OP),
            transcendentals=B_pad * (2 * NP + OP),
            bytes_accessed=(4 * (B_pad * KP + B_pad * OP) + 4 * b_row.size
                            + w_slab.size * w_slab.dtype.itemsize),
        ),
    )(x, w_slab, b_row)

    if return_padded:
        return out
    return out[:B, :A]                      # drop batch/lane padding


def actor_forward(state, params, maxaction):
    """Convenience wrapper: pack + run (prefer pack once + actor_forward_packed)."""
    w_slab, b_row, meta = pack_actor_params(params, state.shape[1])
    return actor_forward_packed(state, w_slab, b_row, meta, maxaction)


def init_params(key, state_dim, action_dim, net_width):
    """PyTorch-style uniform(+-1/sqrt(fan_in)) init; weights stored as (in, out)."""
    dims = [
        ("l1", state_dim, net_width),
        ("l2", net_width, net_width),
        ("l3", net_width, action_dim),
    ]
    params = {}
    for name, fan_in, fan_out in dims:
        key, kw, kb = jax.random.split(key, 3)
        bound = 1.0 / jnp.sqrt(float(fan_in))
        w = jax.random.uniform(kw, (fan_in, fan_out), jnp.float32, -bound, bound)
        b = jax.random.uniform(kb, (fan_out,), jnp.float32, -bound, bound)
        params[name] = (w, b)
    return params


def actor_forward_ref(state, params, maxaction):
    """Pure-JAX reference for correctness checking."""
    w1, b1 = params["l1"]
    w2, b2 = params["l2"]
    w3, b3 = params["l3"]
    a = jnp.tanh(state @ w1 + b1)
    a = jnp.tanh(a @ w2 + b2)
    a = jnp.tanh(a @ w3 + b3) * maxaction
    return a


if __name__ == "__main__":
    key = jax.random.PRNGKey(0)

    batch, state_dim, action_dim, net_width = 8, 12, 4, 32
    maxaction = 2.0

    key, ks, kp = jax.random.split(key, 3)
    state = jax.random.normal(ks, (batch, state_dim), jnp.float32)
    params = init_params(kp, state_dim, action_dim, net_width)

    # ---- small batch, f32 slab (single tile) ----
    w_slab, b_row, meta = pack_actor_params(params, state_dim)
    actions = actor_forward_packed(state, w_slab, b_row, meta, maxaction)
    actions = jax.block_until_ready(actions)
    actions_ref = actor_forward_ref(state, params, maxaction)
    assert actions.shape == (batch, action_dim)
    assert jnp.allclose(actions, actions_ref, atol=1e-4, rtol=1e-4)

    # ---- larger batch exercising the batch grid (multiple tiles, resident slab) ----
    key, kb2 = jax.random.split(key)
    big_batch = 300
    state_big = jax.random.normal(kb2, (big_batch, state_dim), jnp.float32)
    actions_big = actor_forward_packed(state_big, w_slab, b_row, meta, maxaction)
    actions_big = jax.block_until_ready(actions_big)
    assert actions_big.shape == (big_batch, action_dim)
    assert jnp.allclose(actions_big, actor_forward_ref(state_big, params, maxaction),
                        atol=1e-4, rtol=1e-4)

    # ---- bf16 weight slab path (production-width pattern; f32 accumulate/tanh) ----
    w_bf, b_bf, meta_bf = pack_actor_params(params, state_dim,
                                            param_dtype=jnp.bfloat16)
    actions_bf = actor_forward_packed(state, w_bf, b_bf, meta_bf, maxaction)
    actions_bf = jax.block_until_ready(actions_bf)
    assert jnp.allclose(actions_bf, actions_ref, atol=5e-2, rtol=5e-2)

    print("KERNEL_OK")
</pallas_src>

<mosaic_0001>
module attributes {stable_mosaic.version = 11 : i64} {
  func.func @_actor_kernel(%arg0: i32, %arg1: memref<8x128xf32, #tpu.memory_space<vmem>>, %arg2: memref<128x384xf32, #tpu.memory_space<vmem>>, %arg3: memref<1x384xf32, #tpu.memory_space<vmem>>, %arg4: memref<8x128xf32, #tpu.memory_space<vmem>>) attributes {dimension_semantics = [#tpu.dimension_semantics<parallel>], iteration_bounds = array<i64: 1>, scalar_prefetch = 0 : i64, scratch_operands = 0 : i64, tpu.core_type = #tpu.core_type<tc>, window_params = [{transform_indices = @transform_0, window_bounds = array<i64: 8, 128>}, {pipeline_mode = #tpu.pipeline_mode<synchronous>, transform_indices = @transform_1, window_bounds = array<i64: 128, 384>}, {pipeline_mode = #tpu.pipeline_mode<synchronous>, transform_indices = @transform_2, window_bounds = array<i64: 1, 384>}, {transform_indices = @transform_3, window_bounds = array<i64: 8, 128>}]} {
    %c0 = arith.constant 0 : index
    %c0_0 = arith.constant 0 : index
    %0 = vector.load %arg1[%c0, %c0_0] : memref<8x128xf32, #tpu.memory_space<vmem>>, vector<8x128xf32>
    %c0_1 = arith.constant 0 : index
    %c0_2 = arith.constant 0 : index
    %1 = vector.load %arg2[%c0_1, %c0_2] : memref<128x384xf32, #tpu.memory_space<vmem>>, vector<128x128xf32>
    %cst = arith.constant dense<0.000000e+00> : vector<8x128xf32>
    %2 = tpu.matmul %0, %1, %cst {dimension_numbers = #tpu.dot_dimension_numbers<[1], [0], [0], [1], [0, 0, 1, 1], [], []>} : vector<8x128xf32>, vector<128x128xf32>, vector<8x128xf32> -> vector<8x128xf32>
    %c0_3 = arith.constant 0 : index
    %c0_4 = arith.constant 0 : index
    %3 = vector.load %arg3[%c0_3, %c0_4] : memref<1x384xf32, #tpu.memory_space<vmem>>, vector<1x128xf32>
    %4 = vector.broadcast %3 : vector<1x128xf32> to vector<8x128xf32>
    %5 = arith.addf %2, %4 : vector<8x128xf32>
    %6 = math.tanh %5 : vector<8x128xf32>
    %c0_5 = arith.constant 0 : index
    %c128 = arith.constant 128 : index
    %7 = vector.load %arg2[%c0_5, %c128] : memref<128x384xf32, #tpu.memory_space<vmem>>, vector<128x128xf32>
    %cst_6 = arith.constant dense<0.000000e+00> : vector<8x128xf32>
    %8 = tpu.matmul %6, %7, %cst_6 {dimension_numbers = #tpu.dot_dimension_numbers<[1], [0], [0], [1], [0, 0, 1, 1], [], []>} : vector<8x128xf32>, vector<128x128xf32>, vector<8x128xf32> -> vector<8x128xf32>
    %c0_7 = arith.constant 0 : index
    %c128_8 = arith.constant 128 : index
    %9 = vector.load %arg3[%c0_7, %c128_8] : memref<1x384xf32, #tpu.memory_space<vmem>>, vector<1x128xf32>
    %10 = vector.broadcast %9 : vector<1x128xf32> to vector<8x128xf32>
    %11 = arith.addf %8, %10 : vector<8x128xf32>
    %12 = math.tanh %11 : vector<8x128xf32>
    %c0_9 = arith.constant 0 : index
    %c256 = arith.constant 256 : index
    %13 = vector.load %arg2[%c0_9, %c256] : memref<128x384xf32, #tpu.memory_space<vmem>>, vector<128x128xf32>
    %cst_10 = arith.constant dense<0.000000e+00> : vector<8x128xf32>
    %14 = tpu.matmul %12, %13, %cst_10 {dimension_numbers = #tpu.dot_dimension_numbers<[1], [0], [0], [1], [0, 0, 1, 1], [], []>} : vector<8x128xf32>, vector<128x128xf32>, vector<8x128xf32> -> vector<8x128xf32>
    %c0_11 = arith.constant 0 : index
    %c256_12 = arith.constant 256 : index
    %15 = vector.load %arg3[%c0_11, %c256_12] : memref<1x384xf32, #tpu.memory_space<vmem>>, vector<1x128xf32>
    %16 = vector.broadcast %15 : vector<1x128xf32> to vector<8x128xf32>
    %17 = arith.addf %14, %16 : vector<8x128xf32>
    %18 = math.tanh %17 : vector<8x128xf32>
    %cst_13 = arith.constant 2.000000e+00 : f32
    %19 = vector.broadcast %cst_13 : f32 to vector<8x128xf32>
    %20 = arith.mulf %18, %19 : vector<8x128xf32>
    %c0_14 = arith.constant 0 : index
    %c0_15 = arith.constant 0 : index
    %21 = vector.load %arg4[%c0_14, %c0_15] : memref<8x128xf32, #tpu.memory_space<vmem>>, vector<8x128xf32>
    tpu.vector_store %arg4[%c0_14, %c0_15], %20 {strides = array<i32>} : memref<8x128xf32, #tpu.memory_space<vmem>>, vector<8x128xf32>,
    return
  }
  func.func @transform_0(%arg0: i32) -> (i32, i32) {
    %c0_i32 = arith.constant 0 : i32
    %c0_i32_0 = arith.constant 0 : i32
    return %arg0, %c0_i32 : i32, i32
  }
  func.func @transform_1(%arg0: i32) -> (i32, i32) {
    %c0_i32 = arith.constant 0 : i32
    %c0_i32_0 = arith.constant 0 : i32
    %c0_i32_1 = arith.constant 0 : i32
    return %c0_i32, %c0_i32_0 : i32, i32
  }
  func.func @transform_2(%arg0: i32) -> (i32, i32) {
    %c0_i32 = arith.constant 0 : i32
    %c0_i32_0 = arith.constant 0 : i32
    %c0_i32_1 = arith.constant 0 : i32
    return %c0_i32, %c0_i32_0 : i32, i32
  }
  func.func @transform_3(%arg0: i32) -> (i32, i32) {
    %c0_i32 = arith.constant 0 : i32
    %c0_i32_0 = arith.constant 0 : i32
    return %arg0, %c0_i32 : i32, i32
  }
}

</mosaic_0001>

<bundles_post_ra>
// kernel: tpu_custom_call.1
= control target key start
LH: loop header
LB: loop body
LE: loop exit
PB: predicated region body
PF: predicated region fallthrough
CT: control target
= control target key end

     0   :  { %8 = vsyncpa [#allocation3], 0  ;;  %s679_s0 = inlined_call_operand.hbm [shape: f32[8,128], index: 0, kind: input, shape index: {}]   ;;  %s680_s1 = inlined_call_operand.hbm [shape: f32[128,384], index: 1, kind: input, shape index: {}]   ;;  %s681_s2 = inlined_call_operand.vmem [shape: f32[1,384], index: 2, kind: input, shape index: {}]   ;;  %s682_s3 = inlined_call_operand.hbm [shape: f32[8,128], index: 3, kind: output, shape index: {}]  }
   0x1   :  { %9 = vsyncpa [#allocation6], 0 }
   0x2   :  { %10 = vsyncpa [#allocation4], 0  ;;  %s580_s12 = smov [#allocation2]   ;;  %s581_s14 = smov [#allocation5]  }
   0x3   :  { %s17_s13 = sshll.u32 %s580_s12, 4  ;;  %s26_s15 = sshll.u32 %s581_s14, 4  ;;  %s18_s13 = int_to_ptr.vmem [resolvable:$true] %s17_s13  ;;  %s27_s15 = int_to_ptr.vmem [resolvable:$true] %s26_s15 }
   0x4   :  { %s522_s16 = scalar_lea.vmem %s18_s13, 128  ;;  %p527_p1 = scmp.lt.s32.totalorder %s18_s13, %s18_s13 }
   0x5   :  { %p523_p0 = scmp.ne.s32.totalorder %s18_s13, %s522_s16  ;;  %p528_p2 = scmp.lt.s32.totalorder %s522_s16, %s522_s16 }
   0x7   :  { %p529_p3 = por %p528_p2, %p527_p1 }
   0x9   :  { %p530_p4 = pnand %p529_p3, %p523_p0 }
   0xb   :  { %533 = shalt.err (!%p530_p4)
}
   0xc   :  { %20 = dma.hbm_to_vmem [thread:$0]  %s679_s0, 128, %s18_s13, [#allocation3]  }
   0xd   :  { %s542_s19 = scalar_lea.vmem %s27_s15, 6144  ;;  %p547_p6 = scmp.lt.s32.totalorder %s27_s15, %s27_s15 }
   0xe   :  { %p543_p5 = scmp.ne.s32.totalorder %s27_s15, %s542_s19  ;;  %p548_p7 = scmp.lt.s32.totalorder %s542_s19, %s542_s19 }
  0x10   :  { %p549_p8 = por %p548_p7, %p547_p6 }
  0x12   :  { %p550_p9 = pnand %p549_p8, %p543_p5 }
  0x14   :  { %553 = shalt.err (!%p550_p9)
}
  0x15   :  { %s582_s20 = smov 384   ;;  %s583_s21 = smov 24  }
  0x16   :  { %32 = dma.hbm_to_vmem [thread:$0]  %s680_s1, 6144, %s27_s15, [#allocation6], %s582_s20, %s582_s20, %s583_s21  }
  0x17   :  { %574 = dma.done.wait [#allocation3], 128  }
  0x18   :  { %575 = vsyncadd [#allocation3], 4294967168 }
  0x19   :  { %576 = dma.done.wait [#allocation6], 6144  }
  0x1a   :  { %577 = vsyncadd [#allocation6], 4294961152  ;;  %v584_v0 = vmov 0.0   ;;  %vm585_vm0 = vmmov 0   ;;  %v57_v1 = vld [vmem:[#allocation5 + $0x168] sm:$0xff]  ;;  %v56_v2 = vld [vmem:[#allocation5 + $0x150] sm:$0xff] }
  0x1b   :  { %396 = vmatprep.subr.mxu0 %v584_v0  ;;  %428 = vmatprep.mubr.msk.f32.mxu0 %vm585_vm0, %v584_v0  ;;  %v55_v3 = vld [vmem:[#allocation5 + $0x138] sm:$0xff]  ;;  %v54_v4 = vld [vmem:[#allocation5 + $0x120] sm:$0xff]  ;;  %v151_v5 = vld [vmem:[#allocation5 + $0x170] sm:$0xff]  ;;  %s586_s28 = smov [#allocation7]  }
  0x1c   :  { %431 = vmatprep.subr.mxu1 %v584_v0  ;;  %463 = vmatprep.mubr.msk.f32.mxu1 %vm585_vm0, %v584_v0  ;;  %v53_v6 = vld [vmem:[#allocation5 + $0x108] sm:$0xff]  ;;  %v150_v7 = vld [vmem:[#allocation5 + $0x158] sm:$0xff]  ;;  %v149_v8 = vld [vmem:[#allocation5 + $0x140] sm:$0xff]  ;;  %s332_s29 = sshll.u32 %s586_s28, 4  ;;  %s333_s29 = int_to_ptr.vmem [resolvable:$true] %s332_s29 }
  0x1d   :  { %397 = vmatpush3.msra.mxu0 %v57_v1  ;;  %432 = vmatpush3.msra.mxu1 %v151_v5  ;;  %v52_v9 = vld [vmem:[#allocation5 + $0xf0] sm:$0xff]  ;;  %v148_v10 = vld [vmem:[#allocation5 + $0x128] sm:$0xff]  ;;  %v51_v11 = vld [vmem:[#allocation5 + $0xd8] sm:$0xff]  ;;  %s554_s30 = scalar_lea.vmem %s333_s29, 128  ;;  %p559_p11 = scmp.lt.s32.totalorder %s333_s29, %s333_s29 }
  0x1e   :  { %398 = vmatprep.subr.mxu0 %v584_v0  ;;  %433 = vmatprep.subr.mxu1 %v584_v0  ;;  %v147_v12 = vld [vmem:[#allocation5 + $0x110] sm:$0xff]  ;;  %v50_v13 = vld [vmem:[#allocation5 + $0xc0] sm:$0xff]  ;;  %v146_v14 = vld [vmem:[#allocation5 + $0xf8] sm:$0xff]  ;;  %p555_p10 = scmp.ne.s32.totalorder %s333_s29, %s554_s30  ;;  %p560_p12 = scmp.lt.s32.totalorder %s554_s30, %s554_s30 }
  0x1f   :  { %399 = vmatpush3.msra.mxu0 %v56_v2  ;;  %434 = vmatpush3.msra.mxu1 %v150_v7  ;;  %v49_v15 = vld [vmem:[#allocation5 + $0xa8] sm:$0xff]  ;;  %v145_v16 = vld [vmem:[#allocation5 + $0xe0] sm:$0xff]  ;;  %v48_v17 = vld [vmem:[#allocation5 + $0x90] sm:$0xff] }
  0x20   :  { %400 = vmatprep.subr.mxu0 %v584_v0  ;;  %435 = vmatprep.subr.mxu1 %v584_v0  ;;  %v47_v18 = vld [vmem:[#allocation5 + $0x78] sm:$0xff]  ;;  %v46_v19 = vld [vmem:[#allocation5 + $0x60] sm:$0xff]  ;;  %v45_v20 = vld [vmem:[#allocation5 + $0x48] sm:$0xff]  ;;  %p561_p13 = por %p560_p12, %p559_p11 }
  0x21   :  { %401 = vmatpush3.msra.mxu0 %v55_v3  ;;  %436 = vmatpush3.msra.mxu1 %v149_v8  ;;  %v44_v21 = vld [vmem:[#allocation5 + $0x30] sm:$0xff]  ;;  %v43_v22 = vld [vmem:[#allocation5 + $0x18] sm:$0xff]  ;;  %v42_v23 = vld [vmem:[#allocation5] sm:$0xff] }
  0x22   :  { %402 = vmatprep.subr.mxu0 %v584_v0  ;;  %437 = vmatprep.subr.mxu1 %v584_v0  ;;  %v41_v24 = vld [vmem:[#allocation2] sm:$0xff]  ;;  %v144_v25 = vld [vmem:[#allocation5 + $0xc8] sm:$0xff]  ;;  %v143_v26 = vld [vmem:[#allocation5 + $0xb0] sm:$0xff]  ;;  %p562_p0 = pnand %p561_p13, %p555_p10 }
  0x23   :  { %403 = vmatpush3.msra.mxu0 %v54_v4  ;;  %438 = vmatpush3.msra.mxu1 %v148_v10  ;;  %v142_v27 = vld [vmem:[#allocation5 + $0x98] sm:$0xff]  ;;  %v141_v28 = vld [vmem:[#allocation5 + $0x80] sm:$0xff]  ;;  %v140_v29 = vld [vmem:[#allocation5 + $0x68] sm:$0xff] }
  0x24   :  { %404 = vmatprep.subr.mxu0 %v584_v0  ;;  %439 = vmatprep.subr.mxu1 %v584_v0  ;;  %v139_v30 = vld [vmem:[#allocation5 + $0x50] sm:$0xff]  ;;  %v138_v31 = vld [vmem:[#allocation5 + $0x38] sm:$0xff]  ;;  %v137_v32 = vld [vmem:[#allocation5 + $0x20] sm:$0xff] }
  0x25   :  { %405 = vmatpush3.msra.mxu0 %v53_v6  ;;  %440 = vmatpush3.msra.mxu1 %v147_v12  ;;  %v136_v33 = vld [vmem:[#allocation5 + $0x8] sm:$0xff]  ;;  %v245_v34 = vld [vmem:[#allocation5 + $0x178] sm:$0xff]  ;;  %v244_v35 = vld [vmem:[#allocation5 + $0x160] sm:$0xff] }
  0x26   :  { %406 = vmatprep.subr.mxu0 %v584_v0  ;;  %441 = vmatprep.subr.mxu1 %v584_v0  ;;  %v243_v36 = vld [vmem:[#allocation5 + $0x148] sm:$0xff]  ;;  %v242_v37 = vld [vmem:[#allocation5 + $0x130] sm:$0xff]  ;;  %v241_v38 = vld [vmem:[#allocation5 + $0x118] sm:$0xff] }
  0x27   :  { %407 = vmatpush3.msra.mxu0 %v52_v9  ;;  %442 = vmatpush3.msra.mxu1 %v146_v14  ;;  %v240_v39 = vld [vmem:[#allocation5 + $0x100] sm:$0xff]  ;;  %v239_v40 = vld [vmem:[#allocation5 + $0xe8] sm:$0xff]  ;;  %v342_v41 = vld [vmem:[%s681_s2] ss:$0 sm:$0xff] }
  0x28   :  { %408 = vmatprep.subr.mxu0 %v584_v0  ;;  %443 = vmatprep.subr.mxu1 %v584_v0  ;;  %v238_v46 = vld [vmem:[#allocation5 + $0xd0] sm:$0xff]  ;;  %v237_v47 = vld [vmem:[#allocation5 + $0xb8] sm:$0xff]  ;;  %v236_v48 = vld [vmem:[#allocation5 + $0xa0] sm:$0xff] }
  0x29   :  { %409 = vmatpush3.msra.mxu0 %v51_v11  ;;  %444 = vmatpush3.msra.mxu1 %v145_v16  ;;  %v235_v49 = vld [vmem:[#allocation5 + $0x88] sm:$0xff]  ;;  %v234_v50 = vld [vmem:[#allocation5 + $0x70] sm:$0xff]  ;;  %v233_v51 = vld [vmem:[#allocation5 + $0x58] sm:$0xff] }
  0x2a   :  { %410 = vmatprep.subr.mxu0 %v584_v0  ;;  %445 = vmatprep.subr.mxu1 %v584_v0  ;;  %v232_v52 = vld [vmem:[#allocation5 + $0x40] sm:$0xff]  ;;  %v231_v53 = vld [vmem:[#allocation5 + $0x28] sm:$0xff]  ;;  %v230_v54 = vld [vmem:[#allocation5 + $0x10] sm:$0xff] }
  0x2b   :  { %411 = vmatpush3.msra.mxu0 %v50_v13  ;;  %446 = vmatpush3.msra.mxu1 %v144_v25  ;;  %v343_v55 = vld [vmem:[%s681_s2 + $0x1] ss:$0 sm:$0xff]  ;;  %v344_v60 = vld [vmem:[%s681_s2 + $0x2] ss:$0 sm:$0xff] }
  0x2c   :  { %412 = vmatprep.subr.mxu0 %v584_v0  ;;  %447 = vmatprep.subr.mxu1 %v584_v0 }
  0x2d   :  { %413 = vmatpush3.msra.mxu0 %v49_v15  ;;  %448 = vmatpush3.msra.mxu1 %v143_v26 }
  0x2e   :  { %414 = vmatprep.subr.mxu0 %v584_v0  ;;  %449 = vmatprep.subr.mxu1 %v584_v0 }
  0x2f   :  { %415 = vmatpush3.msra.mxu0 %v48_v17  ;;  %450 = vmatpush3.msra.mxu1 %v142_v27 }
  0x30   :  { %416 = vmatprep.subr.mxu0 %v584_v0  ;;  %451 = vmatprep.subr.mxu1 %v584_v0 }
  0x31   :  { %417 = vmatpush3.msra.mxu0 %v47_v18  ;;  %452 = vmatpush3.msra.mxu1 %v141_v28 }
  0x32   :  { %418 = vmatprep.subr.mxu0 %v584_v0  ;;  %453 = vmatprep.subr.mxu1 %v584_v0 }
  0x33   :  { %419 = vmatpush3.msra.mxu0 %v46_v19  ;;  %454 = vmatpush3.msra.mxu1 %v140_v29 }
  0x34   :  { %420 = vmatprep.subr.mxu0 %v584_v0  ;;  %455 = vmatprep.subr.mxu1 %v584_v0 }
  0x35   :  { %421 = vmatpush3.msra.mxu0 %v45_v20  ;;  %456 = vmatpush3.msra.mxu1 %v139_v30 }
  0x36   :  { %422 = vmatprep.subr.mxu0 %v584_v0  ;;  %457 = vmatprep.subr.mxu1 %v584_v0 }
  0x37   :  { %423 = vmatpush3.msra.mxu0 %v44_v21  ;;  %458 = vmatpush3.msra.mxu1 %v138_v31 }
  0x38   :  { %424 = vmatprep.subr.mxu0 %v584_v0  ;;  %459 = vmatprep.subr.mxu1 %v584_v0 }
  0x39   :  { %425 = vmatpush3.msra.mxu0 %v43_v22  ;;  %460 = vmatpush3.msra.mxu1 %v137_v32 }
  0x3a   :  { %426 = vmatprep.subr.mxu0 %v584_v0  ;;  %461 = vmatprep.subr.mxu1 %v584_v0 }
  0x3b   :  { %427 = vmatpush3.msra.mxu0 %v42_v23  ;;  %462 = vmatpush3.msra.mxu1 %v136_v33 }
  0x3c   :  { %429 = vmatmul.mubr.f32.vlgmr.msra.gmra.mxu0 %v41_v24  ;;  %466 = vmatprep.subr.mxu0 %v584_v0 }
  0x3d   :  { %498 = vmatprep.mubr.msk.f32.mxu0 %vm585_vm0, %v584_v0  ;;  %467 = vmatpush3.msra.mxu0 %v245_v34 }
  0x3e   :  { %468 = vmatprep.subr.mxu0 %v584_v0 }
  0x3f   :  { %469 = vmatpush3.msra.mxu0 %v244_v35 }
  0x40   :  { %470 = vmatprep.subr.mxu0 %v584_v0 }
  0x41   :  { %471 = vmatpush3.msra.mxu0 %v243_v36 }
  0x42   :  { %472 = vmatprep.subr.mxu0 %v584_v0 }
  0x43   :  { %473 = vmatpush3.msra.mxu0 %v242_v37 }
  0x44   :  { %474 = vmatprep.subr.mxu0 %v584_v0 }
  0x45   :  { %475 = vmatpush3.msra.mxu0 %v241_v38 }
  0x46   :  { %476 = vmatprep.subr.mxu0 %v584_v0 }
  0x47   :  { %477 = vmatpush3.msra.mxu0 %v240_v39 }
  0x48   :  { %478 = vmatprep.subr.mxu0 %v584_v0 }
  0x49   :  { %479 = vmatpush3.msra.mxu0 %v239_v40 }
  0x4a   :  { %480 = vmatprep.subr.mxu0 %v584_v0 }
  0x4b   :  { %481 = vmatpush3.msra.mxu0 %v238_v46 }
  0x4c   :  { %482 = vmatprep.subr.mxu0 %v584_v0 }
  0x4d   :  { %483 = vmatpush3.msra.mxu0 %v237_v47 }
  0x4e   :  { %484 = vmatprep.subr.mxu0 %v584_v0 }
  0x4f   :  { %485 = vmatpush3.msra.mxu0 %v236_v48 }
  0x50   :  { %486 = vmatprep.subr.mxu0 %v584_v0 }
  0x51   :  { %487 = vmatpush3.msra.mxu0 %v235_v49 }
  0x52   :  { %488 = vmatprep.subr.mxu0 %v584_v0 }
  0x53   :  { %489 = vmatpush3.msra.mxu0 %v234_v50 }
  0x54   :  { %490 = vmatprep.subr.mxu0 %v584_v0 }
  0x55   :  { %491 = vmatpush3.msra.mxu0 %v233_v51 }
  0x56   :  { %492 = vmatprep.subr.mxu0 %v584_v0 }
  0x57   :  { %493 = vmatpush3.msra.mxu0 %v232_v52 }
  0x58   :  { %494 = vmatprep.subr.mxu0 %v584_v0 }
  0x59   :  { %495 = vmatpush3.msra.mxu0 %v231_v53 }
  0x5a   :  { %496 = vmatprep.subr.mxu0 %v584_v0 }
  0x5b   :  { %497 = vmatpush3.msra.mxu0 %v230_v54 }
  0xfc   :  { %v131_v42 = vpop.f32.mrf.mxu0 }
  0xfd   :  { %v132_v43 = vadd.f32 %v342_v41, %v131_v42 }
  0xfe   :  { %v430_v44 = vpop.f32.mrf.mxu0 }
  0xff   :  { %508 = vtanh.f32 %v132_v43 }
 0x10c   :  { %v509_v45 = vpop.eup %508 }
 0x10d   :  { %464 = vmatmul.mubr.f32.vlgmr.msra.gmra.mxu1 %v509_v45 }
 0x1cd   :  { %v225_v56 = vpop.f32.mrf.mxu1 }
 0x1ce   :  { %v226_v57 = vadd.f32 %v343_v55, %v225_v56 }
 0x1cf   :  { %v465_v58 = vpop.f32.mrf.mxu1 }
 0x1d0   :  { %510 = vtanh.f32 %v226_v57 }
 0x1dd   :  { %v511_v59 = vpop.eup %510 }
 0x1de   :  { %499 = vmatmul.mubr.f32.vlgmr.msra.gmra.mxu0 %v511_v59 }
 0x29e   :  { %v319_v61 = vpop.f32.mrf.mxu0 }
 0x29f   :  { %v320_v62 = vadd.f32 %v344_v60, %v319_v61 }
 0x2a0   :  { %v500_v63 = vpop.f32.mrf.mxu0 }
 0x2a1   :  { %512 = vtanh.f32 %v320_v62 }
 0x2ae   :  { %v513_v0 = vpop.eup %512 }
 0x2af   :  { %v324_v1 = vmul.f32 2.0, %v513_v0 }
 0x2b1   :  { %325 = vst [vmem:[#allocation7] sm:$0xff] %v324_v1 }
 0x2b2   :  { %565 = shalt.err (!%p562_p0)
}
 0x2b3   :  { %335 = dma.vmem_to_hbm [thread:$0]  %s333_s29, 128, %s682_s3, [#allocation4]  }
 0x2b4   :  { %578 = dma.done.wait [#allocation4], 128  }
 0x2b5   :  { %579 = vsyncadd [#allocation4], 4294967168 }
 0x2b6   :  { %339 = vsyncpa [#allocation3], 1 }
 0x2b7   :  { %340 = vsyncpa [#allocation6], 1 }
 0x2b8   :  { %341 = vsyncpa [#allocation4], 1 }

</bundles_post_ra>
